<compile_context>
chip_gen: v6e
topology: v6e:2x2x1
jax: 0.10.0
libtpu: 0.0.40
codegen_flags: <defaults>
</compile_context>

<pallas_src>
import functools

import jax
import jax.numpy as jnp
from jax.experimental import pallas as pl
from jax.experimental.pallas import tpu as pltpu

_NEG_PAD = jnp.float32(-1e30)  # bias for padded class columns (kills them in log-softmax)


# --------------------------------------------------------------------------- #
# helpers
# --------------------------------------------------------------------------- #
def _round_up(n, m):
    return ((n + m - 1) // m) * m


def _pick_tile(n, candidates):
    for t in candidates:
        if t <= n and n % t == 0:
            return t
    return n


def _vmem_limit_bytes():
    # v7x has only 64 MiB of VMEM per TensorCore (128 MiB on v5e/v6e); leave
    # headroom for compiler scratch and double buffers.
    try:
        cap = pltpu.get_tpu_info().vmem_capacity_bytes
        return int(min(cap * 3 // 4, 96 << 20))
    except Exception:
        return 48 << 20


def _apply_epilogue(z, epilogue):
    if epilogue == "relu":
        return jnp.maximum(z, 0.0)
    if epilogue == "log_softmax":
        m = jnp.max(z, axis=-1, keepdims=True)
        shifted = z - m
        lse = jnp.log(jnp.sum(jnp.exp(shifted), axis=-1, keepdims=True))
        return shifted - lse
    return z


# --------------------------------------------------------------------------- #
# kernels
# --------------------------------------------------------------------------- #
def _project_kernel(x_ref, w_ref, b_ref, o_ref, *, epilogue):
    # out = epilogue(x @ W + b), one row tile per grid step; W/b stay resident.
    acc = jnp.dot(x_ref[...], w_ref[...], preferred_element_type=jnp.float32)
    acc = acc + b_ref[...]
    o_ref[...] = _apply_epilogue(acc, epilogue).astype(o_ref.dtype)


def _aggregate_kernel(adj_ref, s_ref, b_ref, o_ref, acc_ref, *, epilogue):
    # out = epilogue(adj @ s + b), tiled over (row tile i, contraction tile k)
    # with an f32 accumulator; epilogue only in the last-k finalize branch.
    k = pl.program_id(1)

    @pl.when(k == 0)
    def _():
        acc_ref[...] = jnp.zeros_like(acc_ref)

    acc_ref[...] += jnp.dot(adj_ref[...], s_ref[...],
                            preferred_element_type=jnp.float32)

    @pl.when(k == pl.num_programs(1) - 1)
    def _():
        z = acc_ref[...] + b_ref[...]
        o_ref[...] = _apply_epilogue(z, epilogue).astype(o_ref.dtype)


# --------------------------------------------------------------------------- #
# pallas_call wrappers
# --------------------------------------------------------------------------- #
def _project(x, w, b, *, epilogue, out_dtype, tm, vmem_limit):
    n_pad, kdim = x.shape
    mdim = w.shape[1]
    return pl.pallas_call(
        functools.partial(_project_kernel, epilogue=epilogue),
        out_shape=jax.ShapeDtypeStruct((n_pad, mdim), out_dtype),
        grid_spec=pltpu.PrefetchScalarGridSpec(
            num_scalar_prefetch=0,
            grid=(n_pad // tm,),
            in_specs=[
                pl.BlockSpec((tm, kdim), lambda i: (i, 0)),
                pl.BlockSpec((kdim, mdim), lambda i: (0, 0)),   # resident
                pl.BlockSpec((1, mdim), lambda i: (0, 0)),      # resident
            ],
            out_specs=pl.BlockSpec((tm, mdim), lambda i: (i, 0)),
        ),
        compiler_params=pltpu.CompilerParams(
            dimension_semantics=("parallel",),
            vmem_limit_bytes=vmem_limit,
        ),
    )(x, w, b)


def _aggregate(adj, s, b, *, epilogue, out_dtype, tm, tk, vmem_limit):
    n_pad = adj.shape[0]
    mdim = s.shape[1]
    return pl.pallas_call(
        functools.partial(_aggregate_kernel, epilogue=epilogue),
        out_shape=jax.ShapeDtypeStruct((n_pad, mdim), out_dtype),
        grid_spec=pltpu.PrefetchScalarGridSpec(
            num_scalar_prefetch=0,
            grid=(n_pad // tm, n_pad // tk),
            in_specs=[
                pl.BlockSpec((tm, tk), lambda i, k: (i, k)),
                pl.BlockSpec((tk, mdim), lambda i, k: (k, 0)),
                pl.BlockSpec((1, mdim), lambda i, k: (0, 0)),   # resident
            ],
            out_specs=pl.BlockSpec((tm, mdim), lambda i, k: (i, 0)),
            scratch_shapes=[pltpu.VMEM((tm, mdim), jnp.float32)],
        ),
        compiler_params=pltpu.CompilerParams(
            dimension_semantics=("parallel", "arbitrary"),
            vmem_limit_bytes=vmem_limit,
        ),
    )(adj, s, b)


# --------------------------------------------------------------------------- #
# GCN forward
# --------------------------------------------------------------------------- #
@jax.jit
def gcn_forward(x, adj, w1, b1, w2, b2):
    f32, bf16 = jnp.float32, jnp.bfloat16
    N, F_in = x.shape
    H = w1.shape[1]
    C = w2.shape[1]

    b1 = jnp.reshape(b1, (1, -1)).astype(f32)
    b2 = jnp.reshape(b2, (1, -1)).astype(f32)

    # Pad everything to lane-dense multiples of 128.
    Np = _round_up(N, 128)
    Fp = _round_up(F_in, 128)
    Hp = _round_up(H, 128)
    Cp = _round_up(C, 128)

    x_p = jnp.zeros((Np, Fp), bf16).at[:N, :F_in].set(x.astype(bf16))
    adj_p = jnp.zeros((Np, Np), bf16).at[:N, :N].set(adj.astype(bf16))
    w1_p = jnp.zeros((Fp, Hp), bf16).at[:F_in, :H].set(w1.astype(bf16))
    b1_p = jnp.zeros((1, Hp), f32).at[:, :H].set(b1)
    w2_p = jnp.zeros((Hp, Cp), bf16).at[:H, :C].set(w2.astype(bf16))
    # padded classes get -1e30 bias so the log-softmax normalizer is unchanged
    b2_p = jnp.full((1, Cp), _NEG_PAD, f32).at[:, :C].set(b2)

    zero_bF = jnp.zeros((1, Fp), f32)
    zero_bH = jnp.zeros((1, Hp), f32)
    zero_bC = jnp.zeros((1, Cp), f32)

    tm = _pick_tile(Np, (256, 128))
    tk = _pick_tile(Np, (512, 256, 128))
    vmem_limit = _vmem_limit_bytes()

    kw = dict(tm=tm, vmem_limit=vmem_limit)
    akw = dict(tm=tm, tk=tk, vmem_limit=vmem_limit)

    # ---- Layer 1: h = relu(adj @ x @ W1 + b1), order chosen at trace time ---
    if Fp <= Hp:
        t1 = _aggregate(adj_p, x_p, zero_bF, epilogue="none", out_dtype=bf16, **akw)
        h = _project(t1, w1_p, b1_p, epilogue="relu", out_dtype=bf16, **kw)
    else:
        s1 = _project(x_p, w1_p, zero_bH, epilogue="none", out_dtype=bf16, **kw)
        h = _aggregate(adj_p, s1, b1_p, epilogue="relu", out_dtype=bf16, **akw)

    # Dropout: identity in eval mode.

    # ---- Layer 2 + LogSoftmax(dim=1) ----------------------------------------
    if Hp <= Cp:
        t2 = _aggregate(adj_p, h, zero_bH, epilogue="none", out_dtype=bf16, **akw)
        out_p = _project(t2, w2_p, b2_p, epilogue="log_softmax", out_dtype=f32, **kw)
    else:
        s2 = _project(h, w2_p, zero_bC, epilogue="none", out_dtype=bf16, **kw)
        out_p = _aggregate(adj_p, s2, b2_p, epilogue="log_softmax", out_dtype=f32, **akw)

    return out_p[:N, :C]


# --------------------------------------------------------------------------- #
# references & test
# --------------------------------------------------------------------------- #
def xavier_uniform(key, shape, dtype=jnp.float32):
    fan_in, fan_out = shape
    limit = jnp.sqrt(6.0 / (fan_in + fan_out))
    return jax.random.uniform(key, shape, dtype, minval=-limit, maxval=limit)


def reference_forward_f32(x, adj, w1, b1, w2, b2):
    h = jnp.maximum(adj @ (x @ w1) + b1.reshape(1, -1), 0.0)
    z = adj @ (h @ w2) + b2.reshape(1, -1)
    return jax.nn.log_softmax(z, axis=1)


def reference_forward_bf16(x, adj, w1, b1, w2, b2):
    """Mirrors the kernel numerics (bf16 MXU inputs, f32 acc, bf16 intermediates)."""
    bf16, f32 = jnp.bfloat16, jnp.float32
    dot = lambda a, b: jnp.dot(a.astype(bf16), b.astype(bf16),
                               preferred_element_type=f32)
    F_in, H = w1.shape
    C = w2.shape[1]
    if _round_up(F_in, 128) <= _round_up(H, 128):
        t1 = dot(adj, x).astype(bf16)
        h = jnp.maximum(dot(t1, w1) + b1.reshape(1, -1), 0.0).astype(bf16)
    else:
        s1 = dot(x, w1).astype(bf16)
        h = jnp.maximum(dot(adj, s1) + b1.reshape(1, -1), 0.0).astype(bf16)
    if _round_up(H, 128) <= _round_up(C, 128):
        t2 = dot(adj, h).astype(bf16)
        z = dot(t2, w2) + b2.reshape(1, -1)
    else:
        s2 = dot(h, w2).astype(bf16)
        z = dot(adj, s2) + b2.reshape(1, -1)
    return jax.nn.log_softmax(z, axis=1)


if __name__ == "__main__":
    # Small, deterministic synthetic problem.
    N = 16        # graph nodes
    F_IN = 32     # input features
    HID = 64      # hidden dim
    C = 8         # output classes
    DROPOUT = 0.5  # unused in eval mode

    key = jax.random.PRNGKey(0)
    k_x, k_adj, k_w1, k_w2 = jax.random.split(key, 4)

    x = jax.random.normal(k_x, (N, F_IN), dtype=jnp.float32)

    # Symmetric, row-normalized adjacency with self-loops (typical GCN input).
    a = (jax.random.uniform(k_adj, (N, N)) > 0.7).astype(jnp.float32)
    a = jnp.maximum(a, a.T) + jnp.eye(N, dtype=jnp.float32)
    adj = a / jnp.sum(a, axis=1, keepdims=True)

    # Parameters: xavier_uniform weights, zero biases (matches __init__).
    w1 = xavier_uniform(k_w1, (F_IN, HID))
    b1 = jnp.zeros((HID,), dtype=jnp.float32)
    w2 = xavier_uniform(k_w2, (HID, C))
    b2 = jnp.zeros((C,), dtype=jnp.float32)

    out = jax.block_until_ready(gcn_forward(x, adj, w1, b1, w2, b2))
    assert out.shape == (N, C)

    ref_bf16 = reference_forward_bf16(x, adj, w1, b1, w2, b2)
    assert jnp.allclose(out, ref_bf16, atol=1e-3, rtol=0.0), \
        "mismatch vs bf16-emulated JAX reference"

    ref_f32 = reference_forward_f32(x, adj, w1, b1, w2, b2)
    assert jnp.allclose(out, ref_f32, atol=1e-1, rtol=0.0), \
        "mismatch vs f32 JAX reference"

    print("KERNEL_OK")
</pallas_src>

<mosaic_0001>
module attributes {stable_mosaic.version = 11 : i64} {
  func.func @_aggregate_kernel(%arg0: i32, %arg1: i32, %arg2: memref<128x128xbf16, #tpu.memory_space<vmem>>, %arg3: memref<128x128xbf16, #tpu.memory_space<vmem>>, %arg4: memref<1x128xf32, #tpu.memory_space<vmem>>, %arg5: memref<128x128xbf16, #tpu.memory_space<vmem>>, %arg6: memref<128x128xf32, #tpu.memory_space<vmem>>) attributes {dimension_semantics = [#tpu.dimension_semantics<parallel>, #tpu.dimension_semantics<arbitrary>], iteration_bounds = array<i64: 1, 1>, scalar_prefetch = 0 : i64, scratch_operands = 1 : i64, tpu.core_type = #tpu.core_type<tc>, window_params = [{transform_indices = @transform_0, window_bounds = array<i64: 128, 128>}, {transform_indices = @transform_1, window_bounds = array<i64: 128, 128>}, {pipeline_mode = #tpu.pipeline_mode<synchronous>, transform_indices = @transform_2, window_bounds = array<i64: 1, 128>}, {transform_indices = @transform_3, window_bounds = array<i64: 128, 128>}]} {
    %c0_i32 = arith.constant 0 : i32
    %0 = arith.cmpi eq, %arg1, %c0_i32 : i32
    %1 = arith.extui %0 : i1 to i32
    %c0_i32_0 = arith.constant 0 : i32
    %2 = arith.cmpi ne, %1, %c0_i32_0 : i32
    scf.if %2 {
      %cst_10 = arith.constant 0.000000e+00 : f32
      %12 = vector.broadcast %cst_10 : f32 to vector<128x128xf32>
      %c0_11 = arith.constant 0 : index
      %c0_12 = arith.constant 0 : index
      %13 = vector.load %arg6[%c0_11, %c0_12] : memref<128x128xf32, #tpu.memory_space<vmem>>, vector<128x128xf32>
      tpu.vector_store %arg6[%c0_11, %c0_12], %12 {strides = array<i32>} : memref<128x128xf32, #tpu.memory_space<vmem>>, vector<128x128xf32>,
    } else {
    }
    %c0 = arith.constant 0 : index
    %c0_1 = arith.constant 0 : index
    %3 = vector.load %arg6[%c0, %c0_1] : memref<128x128xf32, #tpu.memory_space<vmem>>, vector<128x128xf32>
    %c0_2 = arith.constant 0 : index
    %c0_3 = arith.constant 0 : index
    %4 = vector.load %arg2[%c0_2, %c0_3] : memref<128x128xbf16, #tpu.memory_space<vmem>>, vector<128x128xbf16>
    %c0_4 = arith.constant 0 : index
    %c0_5 = arith.constant 0 : index
    %5 = vector.load %arg3[%c0_4, %c0_5] : memref<128x128xbf16, #tpu.memory_space<vmem>>, vector<128x128xbf16>
    %cst = arith.constant dense<0.000000e+00> : vector<128x128xf32>
    %6 = tpu.matmul %4, %5, %cst {dimension_numbers = #tpu.dot_dimension_numbers<[1], [0], [0], [1], [0, 0, 1, 1], [], []>} : vector<128x128xbf16>, vector<128x128xbf16>, vector<128x128xf32> -> vector<128x128xf32>
    %7 = arith.addf %3, %6 : vector<128x128xf32>
    %c0_6 = arith.constant 0 : index
    %c0_7 = arith.constant 0 : index
    %8 = vector.load %arg6[%c0_6, %c0_7] : memref<128x128xf32, #tpu.memory_space<vmem>>, vector<128x128xf32>
    tpu.vector_store %arg6[%c0_6, %c0_7], %7 {strides = array<i32>} : memref<128x128xf32, #tpu.memory_space<vmem>>, vector<128x128xf32>,
    %c0_i32_8 = arith.constant 0 : i32
    %9 = arith.cmpi eq, %arg1, %c0_i32_8 : i32
    %10 = arith.extui %9 : i1 to i32
    %c0_i32_9 = arith.constant 0 : i32
    %11 = arith.cmpi ne, %10, %c0_i32_9 : i32
    scf.if %11 {
      %c0_10 = arith.constant 0 : index
      %c0_11 = arith.constant 0 : index
      %12 = vector.load %arg6[%c0_10, %c0_11] : memref<128x128xf32, #tpu.memory_space<vmem>>, vector<128x128xf32>
      %c0_12 = arith.constant 0 : index
      %c0_13 = arith.constant 0 : index
      %13 = vector.load %arg4[%c0_12, %c0_13] : memref<1x128xf32, #tpu.memory_space<vmem>>, vector<1x128xf32>
      %14 = vector.broadcast %13 : vector<1x128xf32> to vector<128x128xf32>
      %15 = arith.addf %12, %14 : vector<128x128xf32>
      %16 = arith.truncf %15 : vector<128x128xf32> to vector<128x128xbf16>
      %c0_14 = arith.constant 0 : index
      %c0_15 = arith.constant 0 : index
      %17 = vector.load %arg5[%c0_14, %c0_15] : memref<128x128xbf16, #tpu.memory_space<vmem>>, vector<128x128xbf16>
      tpu.vector_store %arg5[%c0_14, %c0_15], %16 {strides = array<i32>} : memref<128x128xbf16, #tpu.memory_space<vmem>>, vector<128x128xbf16>,
    } else {
    }
    return
  }
  func.func @transform_0(%arg0: i32, %arg1: i32) -> (i32, i32) {
    %c0_i32 = arith.constant 0 : i32
    return %arg0, %arg1 : i32, i32
  }
  func.func @transform_1(%arg0: i32, %arg1: i32) -> (i32, i32) {
    %c0_i32 = arith.constant 0 : i32
    %c0_i32_0 = arith.constant 0 : i32
    return %arg1, %c0_i32 : i32, i32
  }
  func.func @transform_2(%arg0: i32, %arg1: i32) -> (i32, i32) {
    %c0_i32 = arith.constant 0 : i32
    %c0_i32_0 = arith.constant 0 : i32
    %c0_i32_1 = arith.constant 0 : i32
    return %c0_i32, %c0_i32_0 : i32, i32
  }
  func.func @transform_3(%arg0: i32, %arg1: i32) -> (i32, i32) {
    %c0_i32 = arith.constant 0 : i32
    %c0_i32_0 = arith.constant 0 : i32
    return %arg0, %c0_i32 : i32, i32
  }
}

module attributes {stable_mosaic.version = 11 : i64} {
  func.func @_project_kernel(%arg0: i32, %arg1: memref<128x128xbf16, #tpu.memory_space<vmem>>, %arg2: memref<128x128xbf16, #tpu.memory_space<vmem>>, %arg3: memref<1x128xf32, #tpu.memory_space<vmem>>, %arg4: memref<128x128xbf16, #tpu.memory_space<vmem>>) attributes {dimension_semantics = [#tpu.dimension_semantics<parallel>], iteration_bounds = array<i64: 1>, scalar_prefetch = 0 : i64, scratch_operands = 0 : i64, tpu.core_type = #tpu.core_type<tc>, window_params = [{transform_indices = @transform_0, window_bounds = array<i64: 128, 128>}, {pipeline_mode = #tpu.pipeline_mode<synchronous>, transform_indices = @transform_1, window_bounds = array<i64: 128, 128>}, {pipeline_mode = #tpu.pipeline_mode<synchronous>, transform_indices = @transform_2, window_bounds = array<i64: 1, 128>}, {transform_indices = @transform_3, window_bounds = array<i64: 128, 128>}]} {
    %c0 = arith.constant 0 : index
    %c0_0 = arith.constant 0 : index
    %0 = vector.load %arg1[%c0, %c0_0] : memref<128x128xbf16, #tpu.memory_space<vmem>>, vector<128x128xbf16>
    %c0_1 = arith.constant 0 : index
    %c0_2 = arith.constant 0 : index
    %1 = vector.load %arg2[%c0_1, %c0_2] : memref<128x128xbf16, #tpu.memory_space<vmem>>, vector<128x128xbf16>
    %cst = arith.constant dense<0.000000e+00> : vector<128x128xf32>
    %2 = tpu.matmul %0, %1, %cst {dimension_numbers = #tpu.dot_dimension_numbers<[1], [0], [0], [1], [0, 0, 1, 1], [], []>} : vector<128x128xbf16>, vector<128x128xbf16>, vector<128x128xf32> -> vector<128x128xf32>
    %c0_3 = arith.constant 0 : index
    %c0_4 = arith.constant 0 : index
    %3 = vector.load %arg3[%c0_3, %c0_4] : memref<1x128xf32, #tpu.memory_space<vmem>>, vector<1x128xf32>
    %4 = vector.broadcast %3 : vector<1x128xf32> to vector<128x128xf32>
    %5 = arith.addf %2, %4 : vector<128x128xf32>
    %cst_5 = arith.constant 0.000000e+00 : f32
    %6 = vector.broadcast %cst_5 : f32 to vector<128x128xf32>
    %7 = arith.maximumf %5, %6 : vector<128x128xf32>
    %8 = arith.truncf %7 : vector<128x128xf32> to vector<128x128xbf16>
    %c0_6 = arith.constant 0 : index
    %c0_7 = arith.constant 0 : index
    %9 = vector.load %arg4[%c0_6, %c0_7] : memref<128x128xbf16, #tpu.memory_space<vmem>>, vector<128x128xbf16>
    tpu.vector_store %arg4[%c0_6, %c0_7], %8 {strides = array<i32>} : memref<128x128xbf16, #tpu.memory_space<vmem>>, vector<128x128xbf16>,
    return
  }
  func.func @transform_0(%arg0: i32) -> (i32, i32) {
    %c0_i32 = arith.constant 0 : i32
    %c0_i32_0 = arith.constant 0 : i32
    return %arg0, %c0_i32 : i32, i32
  }
  func.func @transform_1(%arg0: i32) -> (i32, i32) {
    %c0_i32 = arith.constant 0 : i32
    %c0_i32_0 = arith.constant 0 : i32
    %c0_i32_1 = arith.constant 0 : i32
    return %c0_i32, %c0_i32_0 : i32, i32
  }
  func.func @transform_2(%arg0: i32) -> (i32, i32) {
    %c0_i32 = arith.constant 0 : i32
    %c0_i32_0 = arith.constant 0 : i32
    %c0_i32_1 = arith.constant 0 : i32
    return %c0_i32, %c0_i32_0 : i32, i32
  }
  func.func @transform_3(%arg0: i32) -> (i32, i32) {
    %c0_i32 = arith.constant 0 : i32
    %c0_i32_0 = arith.constant 0 : i32
    return %arg0, %c0_i32 : i32, i32
  }
}

module attributes {stable_mosaic.version = 11 : i64} {
  func.func @_project_kernel(%arg0: i32, %arg1: memref<128x128xbf16, #tpu.memory_space<vmem>>, %arg2: memref<128x128xbf16, #tpu.memory_space<vmem>>, %arg3: memref<1x128xf32, #tpu.memory_space<vmem>>, %arg4: memref<128x128xf32, #tpu.memory_space<vmem>>) attributes {dimension_semantics = [#tpu.dimension_semantics<parallel>], iteration_bounds = array<i64: 1>, scalar_prefetch = 0 : i64, scratch_operands = 0 : i64, tpu.core_type = #tpu.core_type<tc>, window_params = [{transform_indices = @transform_0, window_bounds = array<i64: 128, 128>}, {pipeline_mode = #tpu.pipeline_mode<synchronous>, transform_indices = @transform_1, window_bounds = array<i64: 128, 128>}, {pipeline_mode = #tpu.pipeline_mode<synchronous>, transform_indices = @transform_2, window_bounds = array<i64: 1, 128>}, {transform_indices = @transform_3, window_bounds = array<i64: 128, 128>}]} {
    %c0 = arith.constant 0 : index
    %c0_0 = arith.constant 0 : index
    %0 = vector.load %arg1[%c0, %c0_0] : memref<128x128xbf16, #tpu.memory_space<vmem>>, vector<128x128xbf16>
    %c0_1 = arith.constant 0 : index
    %c0_2 = arith.constant 0 : index
    %1 = vector.load %arg2[%c0_1, %c0_2] : memref<128x128xbf16, #tpu.memory_space<vmem>>, vector<128x128xbf16>
    %cst = arith.constant dense<0.000000e+00> : vector<128x128xf32>
    %2 = tpu.matmul %0, %1, %cst {dimension_numbers = #tpu.dot_dimension_numbers<[1], [0], [0], [1], [0, 0, 1, 1], [], []>} : vector<128x128xbf16>, vector<128x128xbf16>, vector<128x128xf32> -> vector<128x128xf32>
    %c0_3 = arith.constant 0 : index
    %c0_4 = arith.constant 0 : index
    %3 = vector.load %arg3[%c0_3, %c0_4] : memref<1x128xf32, #tpu.memory_space<vmem>>, vector<1x128xf32>
    %4 = vector.broadcast %3 : vector<1x128xf32> to vector<128x128xf32>
    %5 = arith.addf %2, %4 : vector<128x128xf32>
    %cst_5 = arith.constant dense<0xFF800000> : vector<128xf32>
    %6 = vector.multi_reduction <maximumf>, %5, %cst_5 [1] : vector<128x128xf32> to vector<128xf32>
    %7 = vector.shape_cast %6 : vector<128xf32> to vector<128x1xf32>
    %8 = vector.broadcast %7 : vector<128x1xf32> to vector<128x128xf32>
    %9 = arith.subf %5, %8 : vector<128x128xf32>
    %10 = math.exp %9 : vector<128x128xf32>
    %cst_6 = arith.constant dense<0.000000e+00> : vector<128xf32>
    %11 = vector.multi_reduction <add>, %10, %cst_6 [1] : vector<128x128xf32> to vector<128xf32>
    %12 = vector.shape_cast %11 : vector<128xf32> to vector<128x1xf32>
    %13 = math.log %12 : vector<128x1xf32>
    %14 = vector.broadcast %13 : vector<128x1xf32> to vector<128x128xf32>
    %15 = arith.subf %9, %14 : vector<128x128xf32>
    %c0_7 = arith.constant 0 : index
    %c0_8 = arith.constant 0 : index
    %16 = vector.load %arg4[%c0_7, %c0_8] : memref<128x128xf32, #tpu.memory_space<vmem>>, vector<128x128xf32>
    tpu.vector_store %arg4[%c0_7, %c0_8], %15 {strides = array<i32>} : memref<128x128xf32, #tpu.memory_space<vmem>>, vector<128x128xf32>,
    return
  }
  func.func @transform_0(%arg0: i32) -> (i32, i32) {
    %c0_i32 = arith.constant 0 : i32
    %c0_i32_0 = arith.constant 0 : i32
    return %arg0, %c0_i32 : i32, i32
  }
  func.func @transform_1(%arg0: i32) -> (i32, i32) {
    %c0_i32 = arith.constant 0 : i32
    %c0_i32_0 = arith.constant 0 : i32
    %c0_i32_1 = arith.constant 0 : i32
    return %c0_i32, %c0_i32_0 : i32, i32
  }
  func.func @transform_2(%arg0: i32) -> (i32, i32) {
    %c0_i32 = arith.constant 0 : i32
    %c0_i32_0 = arith.constant 0 : i32
    %c0_i32_1 = arith.constant 0 : i32
    return %c0_i32, %c0_i32_0 : i32, i32
  }
  func.func @transform_3(%arg0: i32) -> (i32, i32) {
    %c0_i32 = arith.constant 0 : i32
    %c0_i32_0 = arith.constant 0 : i32
    return %arg0, %c0_i32 : i32, i32
  }
}

</mosaic_0001>

<bundles_post_ra>
// kernel: gcn_forward.4
= control target key start
LH: loop header
LB: loop body
LE: loop exit
PB: predicated region body
PF: predicated region fallthrough
CT: control target
= control target key end

     0   :  { %s705_s1 = inlined_call_operand.vmem [shape: bf16[128,128], index: 1, kind: input, shape index: {}]   ;;  %s706_s0 = inlined_call_operand.vmem [shape: bf16[128,128], index: 0, kind: input, shape index: {}]   ;;  %s707_s2 = inlined_call_operand.vmem [shape: f32[1,128], index: 2, kind: input, shape index: {}]   ;;  %s708_s3 = inlined_call_operand.vmem [shape: bf16[128,128], index: 3, kind: output, shape index: {}]  }
   0x1   :  { %v594_v0 = vld [vmem:[%s705_s1 + $0x38] sm:$0xff]   ;;  %v595_v1 = vld [vmem:[%s705_s1 + $0x30] sm:$0xff]   ;;  %v596_v2 = vld [vmem:[%s705_s1 + $0x28] sm:$0xff]  }
   0x2   :  { %546 = vmatprep.subr.bf16.mxu0 %v594_v0  ;;  %578 = vmatprep.subr.bf16.mxu1 %v594_v0  ;;  %v597_v3 = vld [vmem:[%s705_s1 + $0x20] sm:$0xff]   ;;  %v598_v6 = vld [vmem:[%s705_s1 + $0x18] sm:$0xff]   ;;  %v599_v7 = vld [vmem:[%s705_s1 + $0x10] sm:$0xff]  }
   0x3   :  { %547 = vmatpush3.bf16.msra.mxu0 %v594_v0  ;;  %586 = vmatpush3.bf16.msra.mxu1 %v594_v0  ;;  %v602_v4 = vld [vmem:[%s706_s0] sm:$0xff]   ;;  %v600_v8 = vld [vmem:[%s705_s1 + $0x8] sm:$0xff]   ;;  %v606_v12 = vld [vmem:[%s706_s0 + $0x10] sm:$0xff]  }
   0x4   :  { %548 = vmatprep.subr.bf16.mxu0 %v595_v1  ;;  %579 = vmatprep.subr.bf16.mxu1 %v595_v1  ;;  %v603_v5 = vld [vmem:[%s706_s0 + $0x20] sm:$0xff]   ;;  %v604_v10 = vld [vmem:[%s706_s0 + $0x8] sm:$0xff]   ;;  %v607_v13 = vld [vmem:[%s706_s0 + $0x30] sm:$0xff]  }
   0x5   :  { %562 = vmatprep.mubr.bf16.mxu0 %v602_v4  ;;  %570 = vmatprep.mubr.bf16.mxu1 %v603_v5  ;;  %v601_v9 = vld [vmem:[%s705_s1] sm:$0xff]   ;;  %v605_v11 = vld [vmem:[%s706_s0 + $0x28] sm:$0xff]   ;;  %v608_v14 = vld [vmem:[%s706_s0 + $0x18] sm:$0xff]  }
   0x6   :  { %v609_v15 = vld [vmem:[%s706_s0 + $0x38] sm:$0xff]   ;;  %v450_v18 = vld [vmem:[%s707_s2] ss:$0 sm:$0xff] }
   0x7   :  { %549 = vmatpush3.bf16.msra.mxu0 %v595_v1  ;;  %587 = vmatpush3.bf16.msra.mxu1 %v595_v1 }
   0x8   :  { %550 = vmatprep.subr.bf16.mxu0 %v596_v2  ;;  %580 = vmatprep.subr.bf16.mxu1 %v596_v2 }
   0xb   :  { %551 = vmatpush3.bf16.msra.mxu0 %v596_v2  ;;  %588 = vmatpush3.bf16.msra.mxu1 %v596_v2 }
   0xc   :  { %552 = vmatprep.subr.bf16.mxu0 %v597_v3  ;;  %581 = vmatprep.subr.bf16.mxu1 %v597_v3 }
   0xf   :  { %553 = vmatpush3.bf16.msra.mxu0 %v597_v3  ;;  %589 = vmatpush3.bf16.msra.mxu1 %v597_v3 }
  0x10   :  { %554 = vmatprep.subr.bf16.mxu0 %v598_v6  ;;  %582 = vmatprep.subr.bf16.mxu1 %v598_v6 }
  0x13   :  { %555 = vmatpush3.bf16.msra.mxu0 %v598_v6  ;;  %590 = vmatpush3.bf16.msra.mxu1 %v598_v6 }
  0x14   :  { %556 = vmatprep.subr.bf16.mxu0 %v599_v7  ;;  %583 = vmatprep.subr.bf16.mxu1 %v599_v7 }
  0x17   :  { %557 = vmatpush3.bf16.msra.mxu0 %v599_v7  ;;  %591 = vmatpush3.bf16.msra.mxu1 %v599_v7 }
  0x18   :  { %558 = vmatprep.subr.bf16.mxu0 %v600_v8  ;;  %584 = vmatprep.subr.bf16.mxu1 %v600_v8 }
  0x1b   :  { %559 = vmatpush3.bf16.msra.mxu0 %v600_v8  ;;  %592 = vmatpush3.bf16.msra.mxu1 %v600_v8 }
  0x1c   :  { %560 = vmatprep.subr.bf16.mxu0 %v601_v9  ;;  %585 = vmatprep.subr.bf16.mxu1 %v601_v9 }
  0x1f   :  { %561 = vmatpush3.bf16.msra.mxu0 %v601_v9  ;;  %593 = vmatpush3.bf16.msra.mxu1 %v601_v9 }
  0x22   :  { %563 = vmatmul.mubr.bf16.vlgmr.msra.gmra.mxu0 %v604_v10  ;;  %571 = vmatmul.mubr.bf16.vlgmr.msra.gmra.mxu1 %v605_v11 }
  0x23   :  { %566 = vmatprep.mubr.bf16.mxu0 %v606_v12  ;;  %574 = vmatprep.mubr.bf16.mxu1 %v607_v13 }
  0x2a   :  { %567 = vmatmul.mubr.bf16.gmra.mxu0 %v608_v14  ;;  %575 = vmatmul.mubr.bf16.gmra.mxu1 %v609_v15 }
  0xe2   :  { %v564_v16 = vpop.f32.mrf.mxu0  ;;  %v572_v17 = vpop.f32.mrf.mxu1 }
  0xe3   :  { %v336_v23 = vadd.f32 %v564_v16, %v450_v18  ;;  %v344_v24 = vadd.f32 %v572_v17, %v450_v18 }
  0xe4   :  { %v213_v19 = vpop.f32.mrf.mxu0  ;;  %v245_v20 = vpop.f32.mrf.mxu1 }
  0xe5   :  { %v334_v27 = vadd.f32 %v450_v18, %v213_v19  ;;  %v342_v28 = vadd.f32 %v450_v18, %v245_v20 }
  0xe6   :  { %v565_v21 = vpop.f32.mrf.mxu0  ;;  %v573_v22 = vpop.f32.mrf.mxu1 }
  0xe7   :  { %v337_v25 = vadd.f32 %v565_v21, %v450_v18  ;;  %v345_v26 = vadd.f32 %v573_v22, %v450_v18 }
  0xe8   :  { %v216_v29 = vpop.f32.mrf.mxu0  ;;  %v248_v30 = vpop.f32.mrf.mxu1 }
  0xe9   :  { %v491_v31 = vpack.c.bf16 %v337_v25, %v336_v23  ;;  %v511_v32 = vpack.c.bf16 %v345_v26, %v344_v24  ;;  %v335_v33 = vadd.f32 %v450_v18, %v216_v29  ;;  %v343_v34 = vadd.f32 %v450_v18, %v248_v30 }
  0xea   :  { %v568_v35 = vpop.f32.mrf.mxu0  ;;  %v576_v36 = vpop.f32.mrf.mxu1 }
  0xeb   :  { %523 = vst [vmem:[%s708_s3 + $0x8] sm:$0xff] %v491_v31   ;;  %527 = vst [vmem:[%s708_s3 + $0x28] sm:$0xff] %v511_v32   ;;  %v486_v37 = vpack.c.bf16 %v335_v33, %v334_v27  ;;  %v506_v38 = vpack.c.bf16 %v343_v34, %v342_v28  ;;  %v340_v43 = vadd.f32 %v568_v35, %v450_v18 }
  0xec   :  { %v229_v39 = vpop.f32.mrf.mxu0  ;;  %v261_v40 = vpop.f32.mrf.mxu1  ;;  %v348_v44 = vadd.f32 %v576_v36, %v450_v18 }
  0xed   :  { %487 = vst [vmem:[%s708_s3] sm:$0xff] %v486_v37   ;;  %526 = vst [vmem:[%s708_s3 + $0x20] sm:$0xff] %v506_v38   ;;  %v338_v47 = vadd.f32 %v450_v18, %v229_v39  ;;  %v346_v48 = vadd.f32 %v450_v18, %v261_v40 }
  0xee   :  { %v569_v41 = vpop.f32.mrf.mxu0  ;;  %v577_v42 = vpop.f32.mrf.mxu1 }
  0xef   :  { %v341_v45 = vadd.f32 %v569_v41, %v450_v18  ;;  %v349_v46 = vadd.f32 %v577_v42, %v450_v18 }
  0xf0   :  { %v232_v49 = vpop.f32.mrf.mxu0  ;;  %v264_v50 = vpop.f32.mrf.mxu1 }
  0xf1   :  { %v501_v51 = vpack.c.bf16 %v341_v45, %v340_v43  ;;  %v521_v52 = vpack.c.bf16 %v349_v46, %v348_v44  ;;  %v339_v53 = vadd.f32 %v450_v18, %v232_v49  ;;  %v347_v54 = vadd.f32 %v450_v18, %v264_v50 }
  0xf3   :  { %525 = vst [vmem:[%s708_s3 + $0x18] sm:$0xff] %v501_v51   ;;  %529 = vst [vmem:[%s708_s3 + $0x38] sm:$0xff] %v521_v52   ;;  %v496_v55 = vpack.c.bf16 %v339_v53, %v338_v47  ;;  %v516_v56 = vpack.c.bf16 %v347_v54, %v346_v48 }
  0xf5   :  { %524 = vst [vmem:[%s708_s3 + $0x10] sm:$0xff] %v496_v55   ;;  %528 = vst [vmem:[%s708_s3 + $0x30] sm:$0xff] %v516_v56  }

// kernel: gcn_forward.5
= control target key start
LH: loop header
LB: loop body
LE: loop exit
PB: predicated region body
PF: predicated region fallthrough
CT: control target
= control target key end

     0   :  { %s618_s1 = inlined_call_operand.vmem [shape: bf16[128,128], index: 1, kind: input, shape index: {}]   ;;  %s619_s0 = inlined_call_operand.vmem [shape: bf16[128,128], index: 0, kind: input, shape index: {}]   ;;  %s620_s2 = inlined_call_operand.vmem [shape: f32[1,128], index: 2, kind: input, shape index: {}]   ;;  %s621_s3 = inlined_call_operand.vmem [shape: bf16[128,128], index: 3, kind: output, shape index: {}]  }
   0x1   :  { %v507_v0 = vld [vmem:[%s618_s1 + $0x38] sm:$0xff]   ;;  %v508_v1 = vld [vmem:[%s618_s1 + $0x30] sm:$0xff]   ;;  %v509_v2 = vld [vmem:[%s618_s1 + $0x28] sm:$0xff]  }
   0x2   :  { %459 = vmatprep.subr.bf16.mxu0 %v507_v0  ;;  %491 = vmatprep.subr.bf16.mxu1 %v507_v0  ;;  %v510_v3 = vld [vmem:[%s618_s1 + $0x20] sm:$0xff]   ;;  %v511_v6 = vld [vmem:[%s618_s1 + $0x18] sm:$0xff]   ;;  %v512_v7 = vld [vmem:[%s618_s1 + $0x10] sm:$0xff]  }
   0x3   :  { %460 = vmatpush3.bf16.msra.mxu0 %v507_v0  ;;  %499 = vmatpush3.bf16.msra.mxu1 %v507_v0  ;;  %v515_v4 = vld [vmem:[%s619_s0] sm:$0xff]   ;;  %v513_v8 = vld [vmem:[%s618_s1 + $0x8] sm:$0xff]   ;;  %v519_v12 = vld [vmem:[%s619_s0 + $0x10] sm:$0xff]  }
   0x4   :  { %461 = vmatprep.subr.bf16.mxu0 %v508_v1  ;;  %492 = vmatprep.subr.bf16.mxu1 %v508_v1  ;;  %v516_v5 = vld [vmem:[%s619_s0 + $0x20] sm:$0xff]   ;;  %v517_v10 = vld [vmem:[%s619_s0 + $0x8] sm:$0xff]   ;;  %v520_v13 = vld [vmem:[%s619_s0 + $0x30] sm:$0xff]  }
   0x5   :  { %475 = vmatprep.mubr.bf16.mxu0 %v515_v4  ;;  %483 = vmatprep.mubr.bf16.mxu1 %v516_v5  ;;  %v514_v9 = vld [vmem:[%s618_s1] sm:$0xff]   ;;  %v518_v11 = vld [vmem:[%s619_s0 + $0x28] sm:$0xff]   ;;  %v521_v14 = vld [vmem:[%s619_s0 + $0x18] sm:$0xff]  }
   0x6   :  { %v522_v15 = vld [vmem:[%s619_s0 + $0x38] sm:$0xff]   ;;  %v347_v16 = vld [vmem:[%s620_s2] ss:$0 sm:$0xff] }
   0x7   :  { %462 = vmatpush3.bf16.msra.mxu0 %v508_v1  ;;  %500 = vmatpush3.bf16.msra.mxu1 %v508_v1 }
   0x8   :  { %463 = vmatprep.subr.bf16.mxu0 %v509_v2  ;;  %493 = vmatprep.subr.bf16.mxu1 %v509_v2 }
   0xb   :  { %464 = vmatpush3.bf16.msra.mxu0 %v509_v2  ;;  %501 = vmatpush3.bf16.msra.mxu1 %v509_v2 }
   0xc   :  { %465 = vmatprep.subr.bf16.mxu0 %v510_v3  ;;  %494 = vmatprep.subr.bf16.mxu1 %v510_v3 }
   0xf   :  { %466 = vmatpush3.bf16.msra.mxu0 %v510_v3  ;;  %502 = vmatpush3.bf16.msra.mxu1 %v510_v3 }
  0x10   :  { %467 = vmatprep.subr.bf16.mxu0 %v511_v6  ;;  %495 = vmatprep.subr.bf16.mxu1 %v511_v6 }
  0x13   :  { %468 = vmatpush3.bf16.msra.mxu0 %v511_v6  ;;  %503 = vmatpush3.bf16.msra.mxu1 %v511_v6 }
  0x14   :  { %469 = vmatprep.subr.bf16.mxu0 %v512_v7  ;;  %496 = vmatprep.subr.bf16.mxu1 %v512_v7 }
  0x17   :  { %470 = vmatpush3.bf16.msra.mxu0 %v512_v7  ;;  %504 = vmatpush3.bf16.msra.mxu1 %v512_v7 }
  0x18   :  { %471 = vmatprep.subr.bf16.mxu0 %v513_v8  ;;  %497 = vmatprep.subr.bf16.mxu1 %v513_v8 }
  0x1b   :  { %472 = vmatpush3.bf16.msra.mxu0 %v513_v8  ;;  %505 = vmatpush3.bf16.msra.mxu1 %v513_v8 }
  0x1c   :  { %473 = vmatprep.subr.bf16.mxu0 %v514_v9  ;;  %498 = vmatprep.subr.bf16.mxu1 %v514_v9 }
  0x1f   :  { %474 = vmatpush3.bf16.msra.mxu0 %v514_v9  ;;  %506 = vmatpush3.bf16.msra.mxu1 %v514_v9 }
  0x22   :  { %476 = vmatmul.mubr.bf16.vlgmr.msra.gmra.mxu0 %v517_v10  ;;  %484 = vmatmul.mubr.bf16.vlgmr.msra.gmra.mxu1 %v518_v11 }
  0x23   :  { %479 = vmatprep.mubr.bf16.mxu0 %v519_v12  ;;  %487 = vmatprep.mubr.bf16.mxu1 %v520_v13 }
  0x2a   :  { %480 = vmatmul.mubr.bf16.gmra.mxu0 %v521_v14  ;;  %488 = vmatmul.mubr.bf16.gmra.mxu1 %v522_v15 }
  0xe2   :  { %v477_v17 = vpop.f32.mrf.mxu0  ;;  %v485_v18 = vpop.f32.mrf.mxu1 }
  0xe3   :  { %v193_v19 = vadd.f32 %v477_v17, %v347_v16  ;;  %v225_v20 = vadd.f32 %v485_v18, %v347_v16 }
  0xe4   :  { %v184_v21 = vpop.f32.mrf.mxu0  ;;  %v216_v22 = vpop.f32.mrf.mxu1 }
  0xe5   :  { %v185_v23 = vadd.f32 %v347_v16, %v184_v21  ;;  %v217_v24 = vadd.f32 %v347_v16, %v216_v22  ;;  %v249_v29 = vmax.f32 %v193_v19, 0.0  ;;  %v257_v30 = vmax.f32 %v225_v20, 0.0 }
  0xe6   :  { %v478_v25 = vpop.f32.mrf.mxu0  ;;  %v486_v26 = vpop.f32.mrf.mxu1 }
  0xe7   :  { %v196_v27 = vadd.f32 %v478_v25, %v347_v16  ;;  %v228_v28 = vadd.f32 %v486_v26, %v347_v16  ;;  %v247_v37 = vmax.f32 %v185_v23, 0.0  ;;  %v255_v38 = vmax.f32 %v217_v24, 0.0 }
  0xe8   :  { %v187_v31 = vpop.f32.mrf.mxu0  ;;  %v219_v32 = vpop.f32.mrf.mxu1 }
  0xe9   :  { %v250_v33 = vmax.f32 %v196_v27, 0.0  ;;  %v258_v34 = vmax.f32 %v228_v28, 0.0  ;;  %v188_v35 = vadd.f32 %v347_v16, %v187_v31  ;;  %v220_v36 = vadd.f32 %v347_v16, %v219_v32 }
  0xea   :  { %v481_v39 = vpop.f32.mrf.mxu0  ;;  %v489_v40 = vpop.f32.mrf.mxu1 }
  0xeb   :  { %v404_v41 = vpack.c.bf16 %v250_v33, %v249_v29  ;;  %v424_v42 = vpack.c.bf16 %v258_v34, %v257_v30  ;;  %v248_v43 = vmax.f32 %v188_v35, 0.0  ;;  %v256_v44 = vmax.f32 %v220_v36, 0.0 }
  0xec   :  { %v209_v45 = vadd.f32 %v481_v39, %v347_v16  ;;  %v241_v46 = vadd.f32 %v489_v40, %v347_v16  ;;  %v200_v47 = vpop.f32.mrf.mxu0  ;;  %v232_v48 = vpop.f32.mrf.mxu1 }
  0xed   :  { %436 = vst [vmem:[%s621_s3 + $0x8] sm:$0xff] %v404_v41   ;;  %440 = vst [vmem:[%s621_s3 + $0x28] sm:$0xff] %v424_v42   ;;  %v399_v49 = vpack.c.bf16 %v248_v43, %v247_v37  ;;  %v419_v50 = vpack.c.bf16 %v256_v44, %v255_v38  ;;  %v201_v51 = vadd.f32 %v347_v16, %v200_v47 }
  0xee   :  { %v233_v52 = vadd.f32 %v347_v16, %v232_v48  ;;  %v482_v53 = vpop.f32.mrf.mxu0  ;;  %v490_v54 = vpop.f32.mrf.mxu1  ;;  %v253_v57 = vmax.f32 %v209_v45, 0.0  ;;  %v261_v58 = vmax.f32 %v241_v46, 0.0 }
  0xef   :  { %400 = vst [vmem:[%s621_s3] sm:$0xff] %v399_v49   ;;  %439 = vst [vmem:[%s621_s3 + $0x20] sm:$0xff] %v419_v50   ;;  %v212_v55 = vadd.f32 %v482_v53, %v347_v16  ;;  %v244_v56 = vadd.f32 %v490_v54, %v347_v16  ;;  %v251_v1 = vmax.f32 %v201_v51, 0.0 }
  0xf0   :  { %v203_v59 = vpop.f32.mrf.mxu0  ;;  %v235_v60 = vpop.f32.mrf.mxu1  ;;  %v259_v2 = vmax.f32 %v233_v52, 0.0 }
  0xf1   :  { %v254_v61 = vmax.f32 %v212_v55, 0.0  ;;  %v262_v62 = vmax.f32 %v244_v56, 0.0  ;;  %v204_v63 = vadd.f32 %v347_v16, %v203_v59  ;;  %v236_v0 = vadd.f32 %v347_v16, %v235_v60 }
  0xf3   :  { %v414_v3 = vpack.c.bf16 %v254_v61, %v253_v57  ;;  %v434_v4 = vpack.c.bf16 %v262_v62, %v261_v58  ;;  %v252_v5 = vmax.f32 %v204_v63, 0.0  ;;  %v260_v6 = vmax.f32 %v236_v0, 0.0 }
  0xf5   :  { %438 = vst [vmem:[%s621_s3 + $0x18] sm:$0xff] %v414_v3   ;;  %442 = vst [vmem:[%s621_s3 + $0x38] sm:$0xff] %v434_v4   ;;  %v409_v7 = vpack.c.bf16 %v252_v5, %v251_v1  ;;  %v429_v8 = vpack.c.bf16 %v260_v6, %v259_v2 }
  0xf7   :  { %437 = vst [vmem:[%s621_s3 + $0x10] sm:$0xff] %v409_v7   ;;  %441 = vst [vmem:[%s621_s3 + $0x30] sm:$0xff] %v429_v8  }

// kernel: gcn_forward.7
= control target key start
LH: loop header
LB: loop body
LE: loop exit
PB: predicated region body
PF: predicated region fallthrough
CT: control target
= control target key end

     0   :  { %s783_s1 = inlined_call_operand.vmem [shape: bf16[128,128], index: 1, kind: input, shape index: {}]   ;;  %s784_s0 = inlined_call_operand.vmem [shape: bf16[128,128], index: 0, kind: input, shape index: {}]   ;;  %s785_s2 = inlined_call_operand.vmem [shape: f32[1,128], index: 2, kind: input, shape index: {}]   ;;  %s786_s3 = inlined_call_operand.vmem [shape: f32[128,128], index: 3, kind: output, shape index: {}]  }
   0x1   :  { %v508_v0 = vld [vmem:[%s783_s1 + $0x38] sm:$0xff]   ;;  %v509_v1 = vld [vmem:[%s783_s1 + $0x30] sm:$0xff]   ;;  %v510_v2 = vld [vmem:[%s783_s1 + $0x28] sm:$0xff]  }
   0x2   :  { %460 = vmatprep.subr.bf16.mxu0 %v508_v0  ;;  %492 = vmatprep.subr.bf16.mxu1 %v508_v0  ;;  %v511_v3 = vld [vmem:[%s783_s1 + $0x20] sm:$0xff]   ;;  %v512_v6 = vld [vmem:[%s783_s1 + $0x18] sm:$0xff]   ;;  %v513_v7 = vld [vmem:[%s783_s1 + $0x10] sm:$0xff]  }
   0x3   :  { %461 = vmatpush3.bf16.msra.mxu0 %v508_v0  ;;  %500 = vmatpush3.bf16.msra.mxu1 %v508_v0  ;;  %v516_v4 = vld [vmem:[%s784_s0] sm:$0xff]   ;;  %v514_v8 = vld [vmem:[%s783_s1 + $0x8] sm:$0xff]   ;;  %v520_v12 = vld [vmem:[%s784_s0 + $0x10] sm:$0xff]  }
   0x4   :  { %462 = vmatprep.subr.bf16.mxu0 %v509_v1  ;;  %493 = vmatprep.subr.bf16.mxu1 %v509_v1  ;;  %v517_v5 = vld [vmem:[%s784_s0 + $0x20] sm:$0xff]   ;;  %v518_v10 = vld [vmem:[%s784_s0 + $0x8] sm:$0xff]   ;;  %v522_v13 = vld [vmem:[%s784_s0 + $0x30] sm:$0xff]  }
   0x5   :  { %476 = vmatprep.mubr.bf16.mxu0 %v516_v4  ;;  %484 = vmatprep.mubr.bf16.mxu1 %v517_v5  ;;  %v515_v9 = vld [vmem:[%s783_s1] sm:$0xff]   ;;  %v519_v11 = vld [vmem:[%s784_s0 + $0x28] sm:$0xff]   ;;  %v521_v14 = vld [vmem:[%s784_s0 + $0x18] sm:$0xff]  }
   0x6   :  { %v523_v15 = vld [vmem:[%s784_s0 + $0x38] sm:$0xff]   ;;  %v427_v16 = vld [vmem:[%s785_s2] ss:$0 sm:$0xff] }
   0x7   :  { %463 = vmatpush3.bf16.msra.mxu0 %v509_v1  ;;  %501 = vmatpush3.bf16.msra.mxu1 %v509_v1 }
   0x8   :  { %464 = vmatprep.subr.bf16.mxu0 %v510_v2  ;;  %494 = vmatprep.subr.bf16.mxu1 %v510_v2 }
   0xb   :  { %465 = vmatpush3.bf16.msra.mxu0 %v510_v2  ;;  %502 = vmatpush3.bf16.msra.mxu1 %v510_v2 }
   0xc   :  { %466 = vmatprep.subr.bf16.mxu0 %v511_v3  ;;  %495 = vmatprep.subr.bf16.mxu1 %v511_v3 }
   0xf   :  { %467 = vmatpush3.bf16.msra.mxu0 %v511_v3  ;;  %503 = vmatpush3.bf16.msra.mxu1 %v511_v3 }
  0x10   :  { %468 = vmatprep.subr.bf16.mxu0 %v512_v6  ;;  %496 = vmatprep.subr.bf16.mxu1 %v512_v6 }
  0x13   :  { %469 = vmatpush3.bf16.msra.mxu0 %v512_v6  ;;  %504 = vmatpush3.bf16.msra.mxu1 %v512_v6 }
  0x14   :  { %470 = vmatprep.subr.bf16.mxu0 %v513_v7  ;;  %497 = vmatprep.subr.bf16.mxu1 %v513_v7 }
  0x17   :  { %471 = vmatpush3.bf16.msra.mxu0 %v513_v7  ;;  %505 = vmatpush3.bf16.msra.mxu1 %v513_v7 }
  0x18   :  { %472 = vmatprep.subr.bf16.mxu0 %v514_v8  ;;  %498 = vmatprep.subr.bf16.mxu1 %v514_v8 }
  0x1b   :  { %473 = vmatpush3.bf16.msra.mxu0 %v514_v8  ;;  %506 = vmatpush3.bf16.msra.mxu1 %v514_v8 }
  0x1c   :  { %474 = vmatprep.subr.bf16.mxu0 %v515_v9  ;;  %499 = vmatprep.subr.bf16.mxu1 %v515_v9 }
  0x1f   :  { %475 = vmatpush3.bf16.msra.mxu0 %v515_v9  ;;  %507 = vmatpush3.bf16.msra.mxu1 %v515_v9 }
  0x22   :  { %477 = vmatmul.mubr.bf16.vlgmr.msra.gmra.mxu0 %v518_v10  ;;  %485 = vmatmul.mubr.bf16.vlgmr.msra.gmra.mxu1 %v519_v11 }
  0x23   :  { %480 = vmatprep.mubr.bf16.mxu0 %v520_v12  ;;  %488 = vmatprep.mubr.bf16.mxu1 %v522_v13 }
  0x2a   :  { %481 = vmatmul.mubr.bf16.gmra.mxu0 %v521_v14  ;;  %489 = vmatmul.mubr.bf16.gmra.mxu1 %v523_v15 }
  0xe2   :  { %v478_v17 = vpop.f32.mrf.mxu0  ;;  %v486_v18 = vpop.f32.mrf.mxu1 }
  0xe3   :  { %v193_v19 = vadd.f32 %v478_v17, %v427_v16  ;;  %v225_v20 = vadd.f32 %v486_v18, %v427_v16 }
  0xe4   :  { %v184_v21 = vpop.f32.mrf.mxu0  ;;  %v216_v22 = vpop.f32.mrf.mxu1 }
  0xe5   :  { %267 = vmax.xlane.f32.xlu0 %v225_v20  ;;  %251 = vmax.xlane.f32.xlu1 %v193_v19  ;;  %v185_v25 = vadd.f32 %v427_v16, %v184_v21  ;;  %v217_v30 = vadd.f32 %v427_v16, %v216_v22 }
  0xe6   :  { %v479_v23 = vpop.f32.mrf.mxu0  ;;  %v487_v24 = vpop.f32.mrf.mxu1 }
  0xe7   :  { %v196_v26 = vadd.f32 %v479_v23, %v427_v16  ;;  %v228_v31 = vadd.f32 %v487_v24, %v427_v16 }
  0xe8   :  { %v187_v27 = vpop.f32.mrf.mxu0  ;;  %v219_v28 = vpop.f32.mrf.mxu1 }
  0xe9   :  { %253 = vmax.xlane.f32.xlu1 %v196_v26  ;;  %247 = vmax.xlane.f32.xlu0 %v185_v25  ;;  %v188_v34 = vadd.f32 %v427_v16, %v187_v27  ;;  %v220_v35 = vadd.f32 %v427_v16, %v219_v28 }
  0xea   :  { %v482_v29 = vpop.f32.mrf.mxu0  ;;  %v490_v33 = vpop.f32.mrf.mxu1 }
  0xeb   :  { %v209_v38 = vadd.f32 %v482_v29, %v427_v16  ;;  %v662_v47 = vadd.f32 %v490_v33, %v427_v16 }
  0xec   :  { %v200_v32 = vpop.f32.mrf.mxu0  ;;  %v232_v37 = vpop.f32.mrf.mxu1 }
  0xed   :  { %269 = vmax.xlane.f32.xlu1 %v228_v31  ;;  %263 = vmax.xlane.f32.xlu0 %v217_v30  ;;  %v201_v42 = vadd.f32 %v427_v16, %v200_v32  ;;  %v659_v45 = vadd.f32 %v427_v16, %v232_v37 }
  0xee   :  { %v483_v36 = vpop.f32.mrf.mxu0  ;;  %v491_v41 = vpop.f32.mrf.mxu1 }
  0xef   :  { %v212_v39 = vadd.f32 %v483_v36, %v427_v16  ;;  %v664_v48 = vadd.f32 %v491_v41, %v427_v16 }
  0xf0   :  { %v203_v40 = vpop.f32.mrf.mxu0  ;;  %v235_v44 = vpop.f32.mrf.mxu1 }
  0xf1   :  { %265 = vmax.xlane.f32.xlu1 %v220_v35  ;;  %249 = vmax.xlane.f32.xlu0 %v188_v34  ;;  %v204_v43 = vadd.f32 %v427_v16, %v203_v40  ;;  %v236_v46 = vadd.f32 %v427_v16, %v235_v44 }
  0xf5   :  { %261 = vmax.xlane.f32.xlu1 %v212_v39  ;;  %259 = vmax.xlane.f32.xlu0 %v209_v38 }
  0xf9   :  { %257 = vmax.xlane.f32.xlu1 %v204_v43  ;;  %255 = vmax.xlane.f32.xlu0 %v201_v42 }
  0xfd   :  { %273 = vmax.xlane.f32.xlu1 %v236_v46  ;;  %271 = vmax.xlane.f32.xlu0 %v659_v45 }
 0x101   :  { %277 = vmax.xlane.f32.xlu1 %v664_v48  ;;  %275 = vmax.xlane.f32.xlu0 %v662_v47 }
 0x16e   :  { %v268_v49 = vpop.xlane.xlu0 %267  ;;  %v252_v50 = vpop.xlane.xlu1 %251 }
 0x16f   :  { %v668_v51 = vsub.f32 %v193_v19, %v252_v50  ;;  %v670_v52 = vsub.f32 %v225_v20, %v268_v49 }
 0x171   :  { %v299_v53 = vmul.f32 1.442695, %v668_v51  ;;  %v315_v57 = vmul.f32 1.442695, %v670_v52 }
 0x172   :  { %v254_v54 = vpop.xlane.xlu1 %253  ;;  %v248_v55 = vpop.xlane.xlu0 %247 }
 0x173   :  { %v673_v56 = vsub.f32 %v196_v26, %v254_v54  ;;  %524 = vpow2.f32 %v299_v53  ;;  %v676_v58 = vsub.f32 %v185_v25, %v248_v55 }
 0x175   :  { %v301_v59 = vmul.f32 1.442695, %v673_v56  ;;  %v295_v0 = vmul.f32 1.442695, %v676_v58 }
 0x176   :  { %v270_v60 = vpop.xlane.xlu1 %269  ;;  %v264_v61 = vpop.xlane.xlu0 %263 }
 0x177   :  { %526 = vpow2.f32 %v301_v59  ;;  %v679_v62 = vsub.f32 %v228_v31, %v270_v60  ;;  %v681_v63 = vsub.f32 %v217_v30, %v264_v61 }
 0x178   :  { %528 = vpow2.f32 %v315_v57 }
 0x179   :  { %v317_v1 = vmul.f32 1.442695, %v679_v62  ;;  %v311_v4 = vmul.f32 1.442695, %v681_v63 }
 0x17a   :  { %v266_v2 = vpop.xlane.xlu1 %265  ;;  %v250_v3 = vpop.xlane.xlu0 %249 }
 0x17b   :  { %530 = vpow2.f32 %v317_v1  ;;  %v686_v5 = vsub.f32 %v220_v35, %v266_v2  ;;  %v688_v6 = vsub.f32 %v188_v34, %v250_v3 }
 0x17c   :  { %532 = vpow2.f32 %v295_v0 }
 0x17d   :  { %v297_v7 = vmul.f32 1.442695, %v688_v6  ;;  %534 = vpow2.f32 %v311_v4  ;;  %v313_v10 = vmul.f32 1.442695, %v686_v5 }
 0x17e   :  { %v262_v8 = vpop.xlane.xlu1 %261  ;;  %v260_v9 = vpop.xlane.xlu0 %259 }
 0x17f   :  { %v692_v11 = vsub.f32 %v212_v39, %v262_v8  ;;  %v694_v12 = vsub.f32 %v209_v38, %v260_v9  ;;  %536 = vpow2.f32 %v297_v7 }
 0x180   :  { %v525_v13 = vpop.eup %524  ;;  %538 = vpow2.f32 %v313_v10 }
 0x181   :  { %v307_v14 = vmul.f32 1.442695, %v694_v12  ;;  %331 = vadd.xlane.f32.xlu0 %v525_v13  ;;  %v309_v17 = vmul.f32 1.442695, %v692_v11 }
 0x182   :  { %v258_v15 = vpop.xlane.xlu1 %257  ;;  %v256_v16 = vpop.xlane.xlu0 %255 }
 0x183   :  { %v698_v18 = vsub.f32 %v204_v43, %v258_v15  ;;  %v700_v19 = vsub.f32 %v201_v42, %v256_v16  ;;  %540 = vpow2.f32 %v307_v14 }
 0x184   :  { %v527_v20 = vpop.eup %526  ;;  %542 = vpow2.f32 %v309_v17 }
 0x185   :  { %v529_v21 = vpop.eup %528  ;;  %v303_v22 = vmul.f32 1.442695, %v700_v19  ;;  %333 = vadd.xlane.f32.xlu1 %v527_v20  ;;  %v305_v25 = vmul.f32 1.442695, %v698_v18 }
 0x186   :  { %347 = vadd.xlane.f32.xlu0 %v529_v21  ;;  %v274_v23 = vpop.xlane.xlu1 %273  ;;  %v272_v24 = vpop.xlane.xlu0 %271 }
 0x187   :  { %v704_v26 = vsub.f32 %v236_v46, %v274_v23  ;;  %v707_v27 = vsub.f32 %v659_v45, %v272_v24  ;;  %544 = vpow2.f32 %v303_v22 }
 0x188   :  { %v531_v28 = vpop.eup %530  ;;  %546 = vpow2.f32 %v305_v25 }
 0x189   :  { %v533_v29 = vpop.eup %532  ;;  %v319_v30 = vmul.f32 1.442695, %v707_v27  ;;  %349 = vadd.xlane.f32.xlu1 %v531_v28  ;;  %v321_v33 = vmul.f32 1.442695, %v704_v26 }
 0x18a   :  { %327 = vadd.xlane.f32.xlu0 %v533_v29  ;;  %v278_v31 = vpop.xlane.xlu1 %277  ;;  %v276_v32 = vpop.xlane.xlu0 %275 }
 0x18b   :  { %v712_v34 = vsub.f32 %v662_v47, %v276_v32  ;;  %v535_v35 = vpop.eup %534  ;;  %548 = vpow2.f32 %v319_v30  ;;  %v715_v36 = vsub.f32 %v664_v48, %v278_v31 }
 0x18c   :  { %v537_v37 = vpop.eup %536  ;;  %550 = vpow2.f32 %v321_v33 }
 0x18d   :  { %v323_v38 = vmul.f32 1.442695, %v712_v34  ;;  %329 = vadd.xlane.f32.xlu1 %v537_v37  ;;  %v539_v39 = vpop.eup %538  ;;  %v325_v40 = vmul.f32 1.442695, %v715_v36 }
 0x18e   :  { %343 = vadd.xlane.f32.xlu0 %v535_v35 }
 0x18f   :  { %552 = vpow2.f32 %v323_v38 }
 0x190   :  { %v541_v41 = vpop.eup %540  ;;  %554 = vpow2.f32 %v325_v40 }
 0x191   :  { %345 = vadd.xlane.f32.xlu1 %v539_v39  ;;  %v543_v42 = vpop.eup %542 }
 0x192   :  { %339 = vadd.xlane.f32.xlu0 %v541_v41 }
 0x194   :  { %v545_v43 = vpop.eup %544 }
 0x195   :  { %341 = vadd.xlane.f32.xlu1 %v543_v42  ;;  %v547_v44 = vpop.eup %546 }
 0x196   :  { %335 = vadd.xlane.f32.xlu0 %v545_v43 }
 0x198   :  { %v549_v45 = vpop.eup %548 }
 0x199   :  { %337 = vadd.xlane.f32.xlu1 %v547_v44  ;;  %v551_v46 = vpop.eup %550 }
 0x19a   :  { %351 = vadd.xlane.f32.xlu0 %v549_v45 }
 0x19c   :  { %v553_v47 = vpop.eup %552 }
 0x19d   :  { %353 = vadd.xlane.f32.xlu1 %v551_v46  ;;  %v555_v48 = vpop.eup %554 }
 0x19e   :  { %355 = vadd.xlane.f32.xlu0 %v553_v47 }
 0x1a1   :  { %357 = vadd.xlane.f32.xlu1 %v555_v48 }
 0x20a   :  { %v332_v49 = vpop.xlane.xlu0 %331 }
 0x20b   :  { %556 = vlog2.f32 %v332_v49 }
 0x20e   :  { %v334_v50 = vpop.xlane.xlu1 %333 }
 0x20f   :  { %558 = vlog2.f32 %v334_v50  ;;  %v348_v53 = vpop.xlane.xlu0 %347 }
 0x210   :  { %560 = vlog2.f32 %v348_v53 }
 0x212   :  { %v350_v54 = vpop.xlane.xlu1 %349 }
 0x213   :  { %562 = vlog2.f32 %v350_v54  ;;  %v328_v55 = vpop.xlane.xlu0 %327 }
 0x214   :  { %564 = vlog2.f32 %v328_v55 }
 0x216   :  { %v330_v57 = vpop.xlane.xlu1 %329 }
 0x217   :  { %v344_v59 = vpop.xlane.xlu0 %343  ;;  %566 = vlog2.f32 %v330_v57 }
 0x218   :  { %v557_v60 = vpop.eup %556  ;;  %568 = vlog2.f32 %v344_v59 }
 0x219   :  { %v364_v61 = vmul.f32 0.6931472, %v557_v60 }
 0x21a   :  { %v346_v0 = vpop.xlane.xlu1 %345 }
 0x21b   :  { %v340_v1 = vpop.xlane.xlu0 %339  ;;  %v393_v3 = vsub.f32 %v668_v51, %v364_v61  ;;  %570 = vlog2.f32 %v346_v0 }
 0x21c   :  { %v559_v2 = vpop.eup %558  ;;  %572 = vlog2.f32 %v340_v1 }
 0x21d   :  { %v561_v4 = vpop.eup %560  ;;  %v366_v7 = vmul.f32 0.6931472, %v559_v2  ;;  %409 = vst [vmem:[%s786_s3 + $0x10] sm:$0xff] %v393_v3 }
 0x21e   :  { %v380_v8 = vmul.f32 0.6931472, %v561_v4  ;;  %v342_v10 = vpop.xlane.xlu1 %341 }
 0x21f   :  { %v394_v9 = vsub.f32 %v673_v56, %v366_v7  ;;  %v336_v13 = vpop.xlane.xlu0 %335  ;;  %574 = vlog2.f32 %v342_v10 }
 0x220   :  { %v563_v14 = vpop.eup %562  ;;  %v401_v15 = vsub.f32 %v670_v52, %v380_v8  ;;  %576 = vlog2.f32 %v336_v13 }
 0x221   :  { %v565_v16 = vpop.eup %564  ;;  %410 = vst [vmem:[%s786_s3 + $0x18] sm:$0xff] %v394_v9  ;;  %v382_v51 = vmul.f32 0.6931472, %v563_v14 }
 0x222   :  { %417 = vst [vmem:[%s786_s3 + $0x50] sm:$0xff] %v401_v15  ;;  %v360_v17 = vmul.f32 0.6931472, %v565_v16  ;;  %v338_v20 = vpop.xlane.xlu1 %337 }
 0x223   :  { %v402_v56 = vsub.f32 %v679_v62, %v382_v51  ;;  %v352_v21 = vpop.xlane.xlu0 %351  ;;  %578 = vlog2.f32 %v338_v20 }
 0x224   :  { %v391_v22 = vsub.f32 %v676_v58, %v360_v17  ;;  %v567_v52 = vpop.eup %566  ;;  %580 = vlog2.f32 %v352_v21 }
 0x225   :  { %418 = vst [vmem:[%s786_s3 + $0x58] sm:$0xff] %v402_v56  ;;  %v569_v23 = vpop.eup %568  ;;  %v362_v24 = vmul.f32 0.6931472, %v567_v52 }
 0x226   :  { %407 = vst [vmem:[%s786_s3] sm:$0xff] %v391_v22  ;;  %v376_v25 = vmul.f32 0.6931472, %v569_v23  ;;  %v354_v28 = vpop.xlane.xlu1 %353 }
 0x227   :  { %v356_v62 = vpop.xlane.xlu0 %355  ;;  %v392_v29 = vsub.f32 %v688_v6, %v362_v24  ;;  %582 = vlog2.f32 %v354_v28 }
 0x228   :  { %v571_v58 = vpop.eup %570  ;;  %v399_v30 = vsub.f32 %v681_v63, %v376_v25  ;;  %584 = vlog2.f32 %v356_v62 }
 0x229   :  { %v573_v31 = vpop.eup %572  ;;  %408 = vst [vmem:[%s786_s3 + $0x8] sm:$0xff] %v392_v29  ;;  %v378_v32 = vmul.f32 0.6931472, %v571_v58 }
 0x22a   :  { %415 = vst [vmem:[%s786_s3 + $0x40] sm:$0xff] %v399_v30  ;;  %v372_v33 = vmul.f32 0.6931472, %v573_v31  ;;  %v358_v35 = vpop.xlane.xlu1 %357 }
 0x22b   :  { %v400_v37 = vsub.f32 %v686_v5, %v378_v32  ;;  %586 = vlog2.f32 %v358_v35 }
 0x22c   :  { %v575_v6 = vpop.eup %574  ;;  %v397_v38 = vsub.f32 %v694_v12, %v372_v33 }
 0x22d   :  { %v577_v63 = vpop.eup %576  ;;  %416 = vst [vmem:[%s786_s3 + $0x48] sm:$0xff] %v400_v37  ;;  %v374_v39 = vmul.f32 0.6931472, %v575_v6 }
 0x22e   :  { %413 = vst [vmem:[%s786_s3 + $0x30] sm:$0xff] %v397_v38  ;;  %v368_v40 = vmul.f32 0.6931472, %v577_v63 }
 0x22f   :  { %v398_v41 = vsub.f32 %v692_v11, %v374_v39 }
 0x230   :  { %v579_v42 = vpop.eup %578  ;;  %v395_v5 = vsub.f32 %v700_v19, %v368_v40 }
 0x231   :  { %v581_v43 = vpop.eup %580  ;;  %414 = vst [vmem:[%s786_s3 + $0x38] sm:$0xff] %v398_v41  ;;  %v370_v12 = vmul.f32 0.6931472, %v579_v42 }
 0x232   :  { %411 = vst [vmem:[%s786_s3 + $0x20] sm:$0xff] %v395_v5  ;;  %v384_v44 = vmul.f32 0.6931472, %v581_v43 }
 0x233   :  { %v396_v45 = vsub.f32 %v698_v18, %v370_v12 }
 0x234   :  { %v583_v46 = vpop.eup %582  ;;  %v403_v47 = vsub.f32 %v707_v27, %v384_v44 }
 0x235   :  { %v585_v11 = vpop.eup %584  ;;  %412 = vst [vmem:[%s786_s3 + $0x28] sm:$0xff] %v396_v45  ;;  %v386_v19 = vmul.f32 0.6931472, %v583_v46 }
 0x236   :  { %419 = vst [vmem:[%s786_s3 + $0x60] sm:$0xff] %v403_v47  ;;  %v388_v48 = vmul.f32 0.6931472, %v585_v11 }
 0x237   :  { %v404_v49 = vsub.f32 %v704_v26, %v386_v19 }
 0x238   :  { %v587_v50 = vpop.eup %586  ;;  %v405_v53 = vsub.f32 %v712_v34, %v388_v48 }
 0x239   :  { %420 = vst [vmem:[%s786_s3 + $0x68] sm:$0xff] %v404_v49  ;;  %v390_v18 = vmul.f32 0.6931472, %v587_v50 }
 0x23a   :  { %421 = vst [vmem:[%s786_s3 + $0x70] sm:$0xff] %v405_v53 }
 0x23b   :  { %v406_v27 = vsub.f32 %v715_v36, %v390_v18 }
 0x23d   :  { %422 = vst [vmem:[%s786_s3 + $0x78] sm:$0xff] %v406_v27 }

</bundles_post_ra>
